<compile_context>
chip_gen: v7x
topology: tpu7x:2x2x1
jax: 0.10.0
libtpu: 0.0.40
codegen_flags: <defaults>
</compile_context>

<pallas_src>
import functools

import jax
import jax.numpy as jnp
import numpy as np
from jax.experimental import pallas as pl
from jax.experimental.pallas import tpu as pltpu


def _conv3x3_bn_relu_kernel(x_ref, w_ref, b_ref, o_ref, *,
                            H, W, Cin, Cout, block_n, compute_dtype):
    """Processes `block_n` images per grid step.

    x_ref: (block_n, Cin, H*W)   flattened NCHW input images (VMEM)
    w_ref: (Cout, 9*Cin)         BN-folded weights, tap-major ((dy,dx), ci)
    b_ref: (Cout, 1)             BN-folded bias (f32)
    o_ref: (block_n, Cout, H*W)  output (f32) -- lane axis = H*W (dense)
    """
    HW = H * W
    # Lane-position indices (computed once, reused for every tap / image).
    p_idx = jax.lax.broadcasted_iota(jnp.int32, (Cin, HW), 1)   # flat pixel id
    x_idx = p_idx % W                                           # column id

    w_mat = w_ref[...]                       # (Cout, 9*Cin), compute_dtype
    bias = b_ref[...]                        # (Cout, 1), f32

    for b in range(block_n):
        # Shift/mask bookkeeping in f32 (exact for bf16 inputs); the MXU
        # contraction below runs in compute_dtype with f32 accumulation.
        x_im = x_ref[b].astype(jnp.float32)  # (Cin, HW)

        taps = []
        for sy in (-1, 0, 1):                # kernel row offset (dy - 1)
            for sx in (-1, 0, 1):            # kernel col offset (dx - 1)
                s = sy * W + sx              # flat shift on the H*W lane axis
                if s == 0:
                    t = x_im
                else:
                    # t[p] = x_im[(p + s) mod HW]; wrapped lanes masked below.
                    t = pltpu.roll(x_im, shift=(-s) % HW, axis=1)

                # Fused zero padding: mask lanes whose source pixel falls
                # outside the image.  Row overflow == flat-index overflow;
                # column overflow is checked explicitly (x +/- 1 wraps rows).
                valid = None
                if s > 0:
                    valid = p_idx < (HW - s)
                elif s < 0:
                    valid = p_idx >= (-s)
                if sx == -1:
                    vx = x_idx >= 1
                    valid = vx if valid is None else (valid & vx)
                elif sx == 1:
                    vx = x_idx <= (W - 2)
                    valid = vx if valid is None else (valid & vx)
                if valid is not None:
                    t = jnp.where(valid, t, 0.0)
                taps.append(t)

        # im2col slab: one K = 9*Cin contraction instead of 9 tiny matmuls.
        cols = jnp.concatenate(taps, axis=0).astype(compute_dtype)   # (72, HW)
        acc = jnp.dot(w_mat, cols,
                      preferred_element_type=jnp.float32)            # (Cout, HW)
        acc = acc + bias
        o_ref[b] = jnp.maximum(acc, 0.0).astype(o_ref.dtype)


def pixel_weighted_fusion(x_nchw, w_oihw, bias, gamma, beta, run_mean, run_var,
                          eps=1e-5, compute_dtype=jnp.bfloat16, block_n=None):
    """Forward of PixelWeightedFusion.  x_nchw: (N, 2C, H, W) f32 -> (N, C, H, W) f32."""
    N, Cin, H, W = x_nchw.shape
    Cout = w_oihw.shape[0]
    assert w_oihw.shape == (Cout, Cin, 3, 3)
    HW = H * W

    # --- fold BatchNorm (eval mode) into the conv ----------------------------
    scale = gamma / jnp.sqrt(run_var + eps)                      # (Cout,)
    w_folded = w_oihw * scale[:, None, None, None]               # (Cout, Cin, 3, 3)
    b_folded = (bias - run_mean) * scale + beta                  # (Cout,)

    # Tap-major weight matrix: w_mat[co, (dy*3+dx)*Cin + ci] = w_folded[co,ci,dy,dx]
    w_mat = jnp.transpose(w_folded, (0, 2, 3, 1)).reshape(Cout, 9 * Cin)
    w_mat = w_mat.astype(compute_dtype)
    b_col = b_folded.reshape(Cout, 1).astype(jnp.float32)

    # Native NCHW memory order, flattened over H*W: no transpose / pad passes.
    x_flat = x_nchw.reshape(N, Cin, HW).astype(compute_dtype)

    # Batch blocking: amortize per-step overhead (single-TC v5e/v6e) while
    # keeping >= 2 parallel grid steps for v7x's two TensorCores.
    if block_n is None:
        block_n = N // 2 if (N >= 2 and N % 2 == 0) else 1
    assert N % block_n == 0, "block_n must divide N"
    grid = (N // block_n,)

    kernel = functools.partial(
        _conv3x3_bn_relu_kernel, H=H, W=W, Cin=Cin, Cout=Cout,
        block_n=block_n, compute_dtype=compute_dtype)

    out_flat = pl.pallas_call(
        kernel,
        out_shape=jax.ShapeDtypeStruct((N, Cout, HW), jnp.float32),
        grid_spec=pltpu.PrefetchScalarGridSpec(
            num_scalar_prefetch=0,
            grid=grid,
            in_specs=[
                pl.BlockSpec((block_n, Cin, HW), lambda i: (i, 0, 0)),
                pl.BlockSpec((Cout, 9 * Cin), lambda i: (0, 0)),
                pl.BlockSpec((Cout, 1), lambda i: (0, 0)),
            ],
            out_specs=pl.BlockSpec((block_n, Cout, HW), lambda i: (i, 0, 0)),
        ),
        compiler_params=pltpu.CompilerParams(
            dimension_semantics=("parallel",)),
    )(x_flat, w_mat, b_col)

    # (N, Cout, H*W) -> (N, Cout, H, W): free reshape (already channel-major).
    return out_flat.reshape(N, Cout, H, W)


def _reference(x_nchw, w_oihw, bias, gamma, beta, run_mean, run_var, eps=1e-5):
    """Pure-JAX reference (conv + eval-mode BN + ReLU) for validation."""
    y = jax.lax.conv_general_dilated(
        x_nchw, w_oihw, window_strides=(1, 1), padding=((1, 1), (1, 1)),
        dimension_numbers=("NCHW", "OIHW", "NCHW"))
    y = y + bias[None, :, None, None]
    y = (y - run_mean[None, :, None, None]) / jnp.sqrt(
        run_var[None, :, None, None] + eps)
    y = y * gamma[None, :, None, None] + beta[None, :, None, None]
    return jnp.maximum(y, 0.0)


if __name__ == "__main__":
    # PixelWeightedFusion(channel=4): conv in-channels = 2*4 = 8, out-channels = 4.
    channel = 4
    N, Cin, H, W = 2, 2 * channel, 16, 16

    key = jax.random.PRNGKey(0)
    k_x, k_w, k_b, k_g, k_be, k_m, k_v = jax.random.split(key, 7)

    x = jax.random.normal(k_x, (N, Cin, H, W), dtype=jnp.float32)
    w = jax.random.normal(k_w, (channel, Cin, 3, 3), dtype=jnp.float32) * 0.1
    bias = jax.random.normal(k_b, (channel,), dtype=jnp.float32) * 0.1
    gamma = 1.0 + 0.1 * jax.random.normal(k_g, (channel,), dtype=jnp.float32)
    beta = 0.1 * jax.random.normal(k_be, (channel,), dtype=jnp.float32)
    run_mean = 0.1 * jax.random.normal(k_m, (channel,), dtype=jnp.float32)
    run_var = 1.0 + 0.1 * jax.random.uniform(k_v, (channel,), dtype=jnp.float32)

    ref = _reference(x, w, bias, gamma, beta, run_mean, run_var)

    # f32 compute path: tight numerical check against the pure-JAX reference.
    out_f32 = pixel_weighted_fusion(x, w, bias, gamma, beta, run_mean, run_var,
                                    compute_dtype=jnp.float32)
    out_f32 = jax.block_until_ready(out_f32)
    np.testing.assert_allclose(np.asarray(out_f32), np.asarray(ref),
                               rtol=1e-4, atol=1e-4)

    # Default bf16 compute path (half HBM traffic, bf16 MXU, f32 accumulation):
    # compared against the f32 reference with bf16-appropriate tolerance.
    out_bf16 = pixel_weighted_fusion(x, w, bias, gamma, beta, run_mean, run_var)
    out_bf16 = jax.block_until_ready(out_bf16)
    np.testing.assert_allclose(np.asarray(out_bf16), np.asarray(ref),
                               rtol=5e-2, atol=5e-2)

    print("KERNEL_OK")
</pallas_src>

<mosaic_0001>
module attributes {stable_mosaic.version = 11 : i64} {
  func.func @_conv3x3_bn_relu_kernel(%arg0: i32, %arg1: memref<1x8x256xf32, #tpu.memory_space<vmem>>, %arg2: memref<4x72xf32, #tpu.memory_space<vmem>>, %arg3: memref<4x1xf32, #tpu.memory_space<vmem>>, %arg4: memref<1x4x256xf32, #tpu.memory_space<vmem>>) attributes {dimension_semantics = [#tpu.dimension_semantics<parallel>], iteration_bounds = array<i64: 2>, scalar_prefetch = 0 : i64, scratch_operands = 0 : i64, tpu.core_type = #tpu.core_type<tc>, window_params = [{transform_indices = @transform_0, window_bounds = array<i64: 1, 8, 256>}, {pipeline_mode = #tpu.pipeline_mode<synchronous>, transform_indices = @transform_1, window_bounds = array<i64: 4, 72>}, {pipeline_mode = #tpu.pipeline_mode<synchronous>, transform_indices = @transform_2, window_bounds = array<i64: 4, 1>}, {transform_indices = @transform_3, window_bounds = array<i64: 1, 4, 256>}]} {
    %0 = tpu.iota {dimensions = array<i32: 1>} : vector<8x256xi32>
    %c16_i32 = arith.constant 16 : i32
    %c0_i32 = arith.constant 0 : i32
    %1 = arith.cmpi eq, %c16_i32, %c0_i32 : i32
    %c1_i32 = arith.constant 1 : i32
    %2 = arith.select %1, %c1_i32, %c16_i32 : i32
    %3 = vector.broadcast %2 : i32 to vector<8x256xi32>
    %4 = arith.remsi %0, %3 : vector<8x256xi32>
    %c0_i32_0 = arith.constant 0 : i32
    %5 = vector.broadcast %c0_i32_0 : i32 to vector<8x256xi32>
    %6 = arith.cmpi ne, %4, %5 : vector<8x256xi32>
    %c0_i32_1 = arith.constant 0 : i32
    %7 = vector.broadcast %c0_i32_1 : i32 to vector<8x256xi32>
    %8 = arith.cmpi slt, %4, %7 : vector<8x256xi32>
    %c0_i32_2 = arith.constant 0 : i32
    %9 = arith.cmpi slt, %2, %c0_i32_2 : i32
    %10 = vector.broadcast %9 : i1 to vector<8x256xi1>
    %11 = vector.broadcast %10 : vector<8x256xi1> to vector<8x256xi1>
    %12 = arith.xori %8, %11 : vector<8x256xi1>
    %13 = arith.andi %12, %6 : vector<8x256xi1>
    %14 = vector.broadcast %2 : i32 to vector<8x256xi32>
    %15 = arith.addi %4, %14 : vector<8x256xi32>
    %16 = arith.select %13, %15, %4 : vector<8x256xi1>, vector<8x256xi32>
    %c0 = arith.constant 0 : index
    %c0_3 = arith.constant 0 : index
    %17 = vector.load %arg2[%c0, %c0_3] : memref<4x72xf32, #tpu.memory_space<vmem>>, vector<4x72xf32>
    %c0_4 = arith.constant 0 : index
    %c0_5 = arith.constant 0 : index
    %18 = vector.load %arg3[%c0_4, %c0_5] : memref<4x1xf32, #tpu.memory_space<vmem>>, vector<4x1xf32>
    %c0_6 = arith.constant 0 : index
    %c0_7 = arith.constant 0 : index
    %c0_8 = arith.constant 0 : index
    %19 = vector.load %arg1[%c0_6, %c0_7, %c0_8] : memref<1x8x256xf32, #tpu.memory_space<vmem>>, vector<1x8x256xf32>
    %20 = vector.shape_cast %19 : vector<1x8x256xf32> to vector<8x256xf32>
    %c17_i32 = arith.constant 17 : i32
    %21 = tpu.dynamic_rotate %20 by %c17_i32 dim 1 : vector<8x256xf32>, i32 -> vector<8x256xf32>
    %c17_i32_9 = arith.constant 17 : i32
    %22 = vector.broadcast %c17_i32_9 : i32 to vector<8x256xi32>
    %23 = arith.cmpi sge, %0, %22 : vector<8x256xi32>
    %c1_i32_10 = arith.constant 1 : i32
    %24 = vector.broadcast %c1_i32_10 : i32 to vector<8x256xi32>
    %25 = arith.cmpi sge, %16, %24 : vector<8x256xi32>
    %26 = arith.andi %23, %25 : vector<8x256xi1>
    %cst = arith.constant 0.000000e+00 : f32
    %27 = vector.broadcast %cst : f32 to vector<8x256xf32>
    %28 = arith.select %26, %21, %27 : vector<8x256xi1>, vector<8x256xf32>
    %c16_i32_11 = arith.constant 16 : i32
    %29 = tpu.dynamic_rotate %20 by %c16_i32_11 dim 1 : vector<8x256xf32>, i32 -> vector<8x256xf32>
    %c16_i32_12 = arith.constant 16 : i32
    %30 = vector.broadcast %c16_i32_12 : i32 to vector<8x256xi32>
    %31 = arith.cmpi sge, %0, %30 : vector<8x256xi32>
    %cst_13 = arith.constant 0.000000e+00 : f32
    %32 = vector.broadcast %cst_13 : f32 to vector<8x256xf32>
    %33 = arith.select %31, %29, %32 : vector<8x256xi1>, vector<8x256xf32>
    %c15_i32 = arith.constant 15 : i32
    %34 = tpu.dynamic_rotate %20 by %c15_i32 dim 1 : vector<8x256xf32>, i32 -> vector<8x256xf32>
    %c15_i32_14 = arith.constant 15 : i32
    %35 = vector.broadcast %c15_i32_14 : i32 to vector<8x256xi32>
    %36 = arith.cmpi sge, %0, %35 : vector<8x256xi32>
    %c14_i32 = arith.constant 14 : i32
    %37 = vector.broadcast %c14_i32 : i32 to vector<8x256xi32>
    %38 = arith.cmpi sle, %16, %37 : vector<8x256xi32>
    %39 = arith.andi %36, %38 : vector<8x256xi1>
    %cst_15 = arith.constant 0.000000e+00 : f32
    %40 = vector.broadcast %cst_15 : f32 to vector<8x256xf32>
    %41 = arith.select %39, %34, %40 : vector<8x256xi1>, vector<8x256xf32>
    %c1_i32_16 = arith.constant 1 : i32
    %42 = tpu.dynamic_rotate %20 by %c1_i32_16 dim 1 : vector<8x256xf32>, i32 -> vector<8x256xf32>
    %c1_i32_17 = arith.constant 1 : i32
    %43 = vector.broadcast %c1_i32_17 : i32 to vector<8x256xi32>
    %44 = arith.cmpi sge, %0, %43 : vector<8x256xi32>
    %c1_i32_18 = arith.constant 1 : i32
    %45 = vector.broadcast %c1_i32_18 : i32 to vector<8x256xi32>
    %46 = arith.cmpi sge, %16, %45 : vector<8x256xi32>
    %47 = arith.andi %44, %46 : vector<8x256xi1>
    %cst_19 = arith.constant 0.000000e+00 : f32
    %48 = vector.broadcast %cst_19 : f32 to vector<8x256xf32>
    %49 = arith.select %47, %42, %48 : vector<8x256xi1>, vector<8x256xf32>
    %c255_i32 = arith.constant 255 : i32
    %50 = tpu.dynamic_rotate %20 by %c255_i32 dim 1 : vector<8x256xf32>, i32 -> vector<8x256xf32>
    %c255_i32_20 = arith.constant 255 : i32
    %51 = vector.broadcast %c255_i32_20 : i32 to vector<8x256xi32>
    %52 = arith.cmpi slt, %0, %51 : vector<8x256xi32>
    %c14_i32_21 = arith.constant 14 : i32
    %53 = vector.broadcast %c14_i32_21 : i32 to vector<8x256xi32>
    %54 = arith.cmpi sle, %16, %53 : vector<8x256xi32>
    %55 = arith.andi %52, %54 : vector<8x256xi1>
    %cst_22 = arith.constant 0.000000e+00 : f32
    %56 = vector.broadcast %cst_22 : f32 to vector<8x256xf32>
    %57 = arith.select %55, %50, %56 : vector<8x256xi1>, vector<8x256xf32>
    %c241_i32 = arith.constant 241 : i32
    %58 = tpu.dynamic_rotate %20 by %c241_i32 dim 1 : vector<8x256xf32>, i32 -> vector<8x256xf32>
    %c241_i32_23 = arith.constant 241 : i32
    %59 = vector.broadcast %c241_i32_23 : i32 to vector<8x256xi32>
    %60 = arith.cmpi slt, %0, %59 : vector<8x256xi32>
    %c1_i32_24 = arith.constant 1 : i32
    %61 = vector.broadcast %c1_i32_24 : i32 to vector<8x256xi32>
    %62 = arith.cmpi sge, %16, %61 : vector<8x256xi32>
    %63 = arith.andi %60, %62 : vector<8x256xi1>
    %cst_25 = arith.constant 0.000000e+00 : f32
    %64 = vector.broadcast %cst_25 : f32 to vector<8x256xf32>
    %65 = arith.select %63, %58, %64 : vector<8x256xi1>, vector<8x256xf32>
    %c240_i32 = arith.constant 240 : i32
    %66 = tpu.dynamic_rotate %20 by %c240_i32 dim 1 : vector<8x256xf32>, i32 -> vector<8x256xf32>
    %c240_i32_26 = arith.constant 240 : i32
    %67 = vector.broadcast %c240_i32_26 : i32 to vector<8x256xi32>
    %68 = arith.cmpi slt, %0, %67 : vector<8x256xi32>
    %cst_27 = arith.constant 0.000000e+00 : f32
    %69 = vector.broadcast %cst_27 : f32 to vector<8x256xf32>
    %70 = arith.select %68, %66, %69 : vector<8x256xi1>, vector<8x256xf32>
    %c239_i32 = arith.constant 239 : i32
    %71 = tpu.dynamic_rotate %20 by %c239_i32 dim 1 : vector<8x256xf32>, i32 -> vector<8x256xf32>
    %c239_i32_28 = arith.constant 239 : i32
    %72 = vector.broadcast %c239_i32_28 : i32 to vector<8x256xi32>
    %73 = arith.cmpi slt, %0, %72 : vector<8x256xi32>
    %c14_i32_29 = arith.constant 14 : i32
    %74 = vector.broadcast %c14_i32_29 : i32 to vector<8x256xi32>
    %75 = arith.cmpi sle, %16, %74 : vector<8x256xi32>
    %76 = arith.andi %73, %75 : vector<8x256xi1>
    %cst_30 = arith.constant 0.000000e+00 : f32
    %77 = vector.broadcast %cst_30 : f32 to vector<8x256xf32>
    %78 = arith.select %76, %71, %77 : vector<8x256xi1>, vector<8x256xf32>
    %79 = tpu.concatenate %28, %33, %41, %49, %20, %57, %65, %70, %78 in 0 : vector<8x256xf32>, vector<8x256xf32>, vector<8x256xf32>, vector<8x256xf32>, vector<8x256xf32>, vector<8x256xf32>, vector<8x256xf32>, vector<8x256xf32>, vector<8x256xf32> -> vector<72x256xf32>
    %cst_31 = arith.constant dense<0.000000e+00> : vector<4x256xf32>
    %80 = tpu.matmul %17, %79, %cst_31 {dimension_numbers = #tpu.dot_dimension_numbers<[1], [0], [0], [1], [0, 0, 1, 1], [], []>} : vector<4x72xf32>, vector<72x256xf32>, vector<4x256xf32> -> vector<4x256xf32>
    %81 = vector.broadcast %18 : vector<4x1xf32> to vector<4x256xf32>
    %82 = arith.addf %80, %81 : vector<4x256xf32>
    %cst_32 = arith.constant 0.000000e+00 : f32
    %83 = vector.broadcast %cst_32 : f32 to vector<4x256xf32>
    %84 = arith.maximumf %82, %83 : vector<4x256xf32>
    %c0_33 = arith.constant 0 : index
    %c0_34 = arith.constant 0 : index
    %c0_35 = arith.constant 0 : index
    %85 = vector.load %arg4[%c0_33, %c0_34, %c0_35] : memref<1x4x256xf32, #tpu.memory_space<vmem>>, vector<1x4x256xf32>
    %86 = vector.shape_cast %85 : vector<1x4x256xf32> to vector<4x256xf32>
    %87 = vector.shape_cast %84 : vector<4x256xf32> to vector<1x4x256xf32>
    tpu.vector_store %arg4[%c0_33, %c0_34, %c0_35], %87 {strides = array<i32>} : memref<1x4x256xf32, #tpu.memory_space<vmem>>, vector<1x4x256xf32>,
    return
  }
  func.func @transform_0(%arg0: i32) -> (i32, i32, i32) {
    %c0_i32 = arith.constant 0 : i32
    %c0_i32_0 = arith.constant 0 : i32
    %c0_i32_1 = arith.constant 0 : i32
    return %arg0, %c0_i32, %c0_i32_0 : i32, i32, i32
  }
  func.func @transform_1(%arg0: i32) -> (i32, i32) {
    %c0_i32 = arith.constant 0 : i32
    %c0_i32_0 = arith.constant 0 : i32
    %c0_i32_1 = arith.constant 0 : i32
    return %c0_i32, %c0_i32_0 : i32, i32
  }
  func.func @transform_2(%arg0: i32) -> (i32, i32) {
    %c0_i32 = arith.constant 0 : i32
    %c0_i32_0 = arith.constant 0 : i32
    %c0_i32_1 = arith.constant 0 : i32
    return %c0_i32, %c0_i32_0 : i32, i32
  }
  func.func @transform_3(%arg0: i32) -> (i32, i32, i32) {
    %c0_i32 = arith.constant 0 : i32
    %c0_i32_0 = arith.constant 0 : i32
    %c0_i32_1 = arith.constant 0 : i32
    return %arg0, %c0_i32, %c0_i32_0 : i32, i32, i32
  }
}

</mosaic_0001>

<bundles_post_ra>
// kernel: tpu_custom_call.1
= control target key start
LH: loop header
LB: loop body
LE: loop exit
PB: predicated region body
PF: predicated region fallthrough
CT: control target
= control target key end

     0   :  { %8 = vsyncpa [#allocation3], 0  ;;  %s1080_s0 = inlined_call_operand.hbm [shape: f32[2,8,256], index: 0, kind: input, shape index: {}]   ;;  %s1081_s1 = inlined_call_operand.vmem [shape: f32[4,72], index: 1, kind: input, shape index: {}]   ;;  %s1082_s2 = inlined_call_operand.vmem [shape: f32[4,1], index: 2, kind: input, shape index: {}]   ;;  %s1083_s3 = inlined_call_operand.hbm [shape: f32[2,4,256], index: 3, kind: output, shape index: {}]  }
   0x1   :  { %10 = vsyncpa [#allocation3 + $0x1], 0 }
   0x2   :  { %11 = vsyncpa [#allocation4], 0 }
   0x3   :  { %13 = vsyncpa [#allocation4 + $0x1], 0  ;;  %s774_s12 = smov 0   ;;  %s776_s13 = smov 0  }
   0x4   :  { %s778_s14 = smov 0   ;;  %s780_s15 = smov 0  }
   0x5 LB: > { %s795_s16 = sadd.s32 4294967295, %s739_s15   ;;  %s494_s17 = sadd.s32 4294967294, %s739_s15   ;;  %s739_s15 = sphi %s780_s15, %s1117_s15   ;;  %s735_s14 = sphi %s778_s14, %s1116_s14   ;;  %s731_s13 = sphi %s776_s13, %s1115_s13   ;;  %s727_s12 = sphi %s774_s12, %s1114_s12  }
   0x6   : > { %s799_s18 = sadd.s32 1, %s739_s15   ;;  %s26_s19 = sadd.s32 1, %s735_s14 }
   0x7   : > { %s23_s20 = ssub.s32 %s739_s15, %s799_s18  ;;  %p33_p0 = scmp.ne.s32.totalorder %s735_s14, %s731_s13 }
   0x8   : > { %p24_p1 = scmp.eq.s32.totalorder %s23_s20, 0  ;;  %p34_p2 = scmp.eq.s32.totalorder %s739_s15, 0 }
   0x9   : > { %p39_p3 = scmp.ne.s32.totalorder %s731_s13, %s727_s12  ;;  %p40_p4 = scmp.eq.s32.totalorder %s795_s16, 0 }
   0xa   : > { %s811_s21 = scalar_select %p24_p1, %s735_s14, %s26_s19  }
   0xb   : > { %p813_p5 = por %p34_p2, %p33_p0  ;;  %p817_p6 = por %p40_p4, %p39_p3 }
   0xc   : > { %p105_p7 = scmp.eq.s32.totalorder %s795_s16, 1  ;;  %p111_p8 = scmp.eq.s32.totalorder %s494_s17, 1 }
   0xd   : > { %p561_p10 = scmp.lt.s32.totalorder %s739_s15, 2  ;;  %s137_s26 = sand.u32 1, %s735_s14  }
   0xe   : > { %p824_p11 = por %p105_p7, %p33_p0  ;;  %p828_p12 = por %p111_p8, %p39_p3 }
   0xf   : > { %s523_s27 = sshll.u32 %s739_s15, 8  ;;  %s497_s28 = sshll.u32 %s137_s26, 4 }
  0x10   : > { %s1089_s24 = scalar_select %p824_p11, 1, 0 }
  0x11   : > { %s1090_s25 = scalar_select %p828_p12, 1, 0 }
  0x12   : > { %s837_s4 = scalar_lea.hbm %s1080_s0, %s523_s27  ;;  %s141_s5 = scalar_lea.vmem [#allocation2], %s497_s28 }
  0x13   : > { %s149_s6 = sshll.u32 %s141_s5, 4  ;;  %p841_p13 = pnand %p561_p10, %p813_p5  ;;  %s845_s6 = int_to_ptr.vmem [resolvable:$true] %s149_s6 }
  0x14   : > { %s138_s8 = scalar_lea.sflag [#allocation3], %s137_s26  ;;  %s643_s9 = scalar_lea.hbm %s837_s4, 256 }
  0x15   : > { %p644_p2 = scmp.ne.s32.totalorder %s837_s4, %s643_s9  ;;  %p645_p3 = pneg %p841_p13 }
  0x16   : > { %s648_s17 = scalar_lea.hbm %s1080_s0, 512  ;;  %p649_p5 = scmp.lt.u32.totalorder %s837_s4, %s1080_s0 }
  0x17   : > { %p646_p4 = pnand %p645_p3, %p644_p2  ;;  %p650_p8 = scmp.lt.u32.totalorder %s648_s17, %s643_s9 }
  0x18   : > { %p652_p9 = scmp.lt.u32.totalorder %s643_s9, %s837_s4 }
  0x19   : > { %p647_p7 = pneg %p646_p4  ;;  %p651_p10 = por %p650_p8, %p649_p5 }
  0x1b   : > { %p653_p0 = por %p652_p9, %p651_p10 }
  0x1d   : > { %p654_p1 = pnand %p653_p0, %p647_p7 }
  0x1f   : > { %657 = shalt.err (!%p654_p1)
}
  0x20   : > { %s658_s22 = scalar_lea.vmem %s845_s6, 256  ;;  %s741_s26 = smov [#allocation2]  }
  0x21   : > { %p659_p2 = scmp.ne.s32.totalorder %s845_s6, %s658_s22  ;;  %s663_s27 = sshll.u32 %s741_s26, 4  ;;  %s664_s27 = int_to_ptr.vmem [resolvable:$false] %s663_s27 }
  0x22   : > { %s665_s28 = scalar_lea.vmem %s664_s27, 512  ;;  %p666_p11 = scmp.lt.s32.totalorder %s845_s6, %s664_s27 }
  0x23   : > { %p661_p4 = pnand %p659_p2, %p645_p3  ;;  %p667_p5 = scmp.lt.s32.totalorder %s665_s28, %s658_s22 }
  0x25   : > { %p662_p12 = pneg %p661_p4  ;;  %p668_p8 = por %p667_p5, %p666_p11 }
  0x27   : > { %p669_p9 = pnand %p668_p8, %p662_p12 }
  0x29   : > { %672 = shalt.err (!%p669_p9)
}
  0x2a   : > { %556 = dma.hbm_to_vmem [thread:$0]  (!%p841_p13), %s837_s4, 256, %s845_s6, %s138_s8  }
  0x2b   : > { %p1092_p0 = scmp.lt.s32.totalorder %s739_s15, 3  ;;  %p1093_p1 = scmp.ge.s32.totalorder %s739_s15, 1 }
  0x2d   : > { %p155_p3 = pnand %p1093_p1, %p1092_p0 }
  0x2e   : > { %s879_s29 = sand.u32 (!%p155_p3), 1, %s731_s13  }
  0x2f   : > { %158 = sbr.rel (%p155_p3) target bundleno = 433 (0x1b1), region = 32  ;;  %s501_s30 = sshll.u32 (!%p155_p3), %s879_s29, 4 }
  0x30   : > { %s161_s5 = scalar_lea.sflag (!%p155_p3), [#allocation3], %s879_s29  ;;  %s164_s9 = scalar_lea.vmem (!%p155_p3), [#allocation2], %s501_s30 }
  0x36   : > { %718 = dma.done.wait (%p817_p6), %s161_s5, 256  }
  0x37   : > { %720 = vsyncadd (%p817_p6), %s161_s5, 4294967040  ;;  %v887_v0 = vld [vmem:[%s164_s9] sm:$0xff]  ;;  %v889_v1 = vld [vmem:[%s164_s9 + $0x8] sm:$0xff]  ;;  %s742_s4 = smov 15   ;;  %s743_s6 = smov 17   ;;  %v750_v3 = vmov 0.0   ;;  %v187_v6 = vlaneseq }
  0x38   : > { %v616_v2 = vpack.i.bf16 %v889_v1, %v887_v0  ;;  %s744_s7 = smov 1   ;;  %s745_s8 = smov 16   ;;  %395 = vmatprep.mubr.f32.mxu0 %v750_v3  ;;  %v215_v4 = vld [vmem:[%s1082_s2] sm:$0xf]  ;;  %v751_v5 = vmov 0   ;;  %vm1085_vm13 = vmmov 1  }
  0x39   : > { %s746_s10 = smov 127   ;;  %s747_s11 = smov 113   ;;  %641 = vset.pattern.permute.xlu1 %v751_v5  ;;  %642 = vset.pattern.permute.xlu0 %v751_v5  ;;  %v898_v7 = vand.u32 127, %v187_v6 }
  0x3a   : > { %617 = vrot.lane.b32.xlu1 %v616_v2, %s742_s4  ;;  %607 = vrot.lane.b32.xlu0 %v616_v2, %s743_s6  ;;  %s748_s23 = smov 112   ;;  %s749_s17 = smov 111  }
  0x3b   : > { %v901_v8 = vadd.s32 128, %v898_v7  ;;  %v194_v9 = vand.u32 15, %v898_v7  ;;  %vm225_vm0 = vcmp.ge.s32.totalorder %v898_v7, 17  ;;  %vm248_vm2 = vcmp.lt.s32.totalorder %v898_v7, 15  ;;  %s502_s27 = sshll.u32 %s879_s29, 3  ;;  %s524_s28 = sshll.u32 %s795_s16, 7 }
  0x3c   : > { %vm240_vm3 = vcmp.ge.s32.totalorder %v898_v7, 16  ;;  %vm263_vm5 = vcmp.lt.s32.totalorder %v898_v7, 1  ;;  %vm222_vm6 = vcmp.lt.s32.totalorder %v898_v7, 17  ;;  %vm237_vm8 = vcmp.lt.s32.totalorder %v898_v7, 16  ;;  %s186_s30 = scalar_lea.vmem [#allocation5], %s502_s27  ;;  %s1036_s6 = scalar_lea.hbm %s1083_s3, %s524_s28 }
  0x3d   : > { %v201_v10 = vand.u32 15, %v901_v8  ;;  %vm906_vm1 = vcmp.ge.s32.totalorder %v194_v9, 1  ;;  %vm251_vm10 = vcmp.ge.s32.totalorder %v898_v7, 15  ;;  %vm926_vm11 = vcmp.le.s32.totalorder %v194_v9, 14  ;;  %s424_s5 = sshll.u32 %s186_s30, 4  ;;  %p1111_p11 = scmp.ne.s32.totalorder %s1089_s24, 0  ;;  %s1038_s5 = int_to_ptr.vmem [resolvable:$true] %s424_s5 }
  0x3e   : > { %622 = vrot.lane.b32.xlu1 %v616_v2, %s744_s7  ;;  %612 = vrot.lane.b32.xlu0 %v616_v2, %s745_s8  ;;  %vm229_vm4 = vmand %vm225_vm0, %vm906_vm1  ;;  %vm266_vm15 = vcmp.ge.s32.totalorder %v898_v7, 1  ;;  %vm280_vm0 = vcmp.lt.s32.totalorder %v901_v8, 255  ;;  %s410_s7 = scalar_lea.sflag [#allocation4], %s879_s29  ;;  %s673_s8 = scalar_lea.vmem %s1038_s5, 128 }
  0x3f   : > { %vm916_vm7 = vcmp.ge.s32.totalorder %v201_v10, 1  ;;  %vm921_vm9 = vcmp.le.s32.totalorder %v201_v10, 14  ;;  %vm932_vm12 = vmpackc.low %vm240_vm3, %vm229_vm4  ;;  %vm276_vm4 = vcmp.lt.s32.totalorder %v898_v7, 127  ;;  %p674_p6 = scmp.ne.s32.totalorder %s1038_s5, %s673_s8  ;;  %s753_s16 = smov [#allocation5]  }
  0x40   : > { %vm943_vm14 = vmpackc.low %vm1085_vm13, %vm916_vm7 }
  0x41   : > { %vm532_vm3 = vmpackc.low %vm916_vm7, %vm921_vm9  ;;  %p675_p12 = pnand %p674_p6, %p1111_p11 }
  0x42   : > { %627 = vrot.lane.b32.xlu0 %v616_v2, %s746_s10  ;;  %632 = vrot.lane.b32.xlu1 %v616_v2, %s747_s11  ;;  %vm966_vm13 = vmand %vm251_vm10, %vm926_vm11  ;;  %s677_s10 = sshll.u32 %s753_s16, 4  ;;  %s678_s10 = int_to_ptr.vmem [resolvable:$false] %s677_s10 }
  0x43   : > { %vm282_vm10 = vmand %vm280_vm0, %vm921_vm9  ;;  %p676_p13 = pneg %p675_p12  ;;  %s679_s11 = scalar_lea.vmem %s678_s10, 256 }
  0x44   : > { %p680_p7 = scmp.lt.s32.totalorder %s1038_s5, %s678_s10  ;;  %p681_p10 = scmp.lt.s32.totalorder %s679_s11, %s673_s8 }
  0x46   : > { %637 = vrot.lane.b32.xlu0 %v616_v2, %s748_s23  ;;  %309 = vrot.lane.b32.xlu1 %v887_v0, %s749_s17  ;;  %v214_v2 = vld [vmem:[%s1081_s1] sm:$0xf]  ;;  %p682_p2 = por %p681_p10, %p680_p7 }
  0x48   : > { %p683_p4 = pnand %p682_p2, %p676_p13 }
  0x4a   : > { %311 = vrot.lane.b32.xlu0 %v889_v1, %s749_s17  ;;  %324 = vperm.xlu1 %641, %v215_v4  }
  0xac   : > { %v618_v12 = vpop.permute.xlu1 %617  ;;  %v608_v13 = vpop.permute.xlu0 %607 }
  0xad   : > { %v620_v14 = vunpack.i.h.bf16 %v618_v12  ;;  %v619_v15 = vunpack.i.l.bf16 %v618_v12  ;;  %v610_v16 = vunpack.i.h.bf16 %v608_v13  ;;  %v609_v17 = vunpack.i.l.bf16 %v608_v13 }
  0xaf   : > { %v249_v28 = vsel %vm248_vm2, %v619_v15, %v620_v14  ;;  %v223_v29 = vsel %vm222_vm6, %v609_v17, %v610_v16  ;;  %v224_v33 = vsel %vm222_vm6, %v610_v16, %v609_v17  ;;  %vm974_vm6 = vmand %vm266_vm15, %vm906_vm1  ;;  %v250_v45 = vsel %vm248_vm2, %v620_v14, %v619_v15 }
  0xb0   : > { %v623_v19 = vpop.permute.xlu1 %622  ;;  %v613_v20 = vpop.permute.xlu0 %612  ;;  %vm293_vm2 = vcmp.lt.s32.totalorder %v901_v8, 241 }
  0xb1   : > { %v625_v23 = vunpack.i.h.bf16 %v623_v19  ;;  %v624_v24 = vunpack.i.l.bf16 %v623_v19  ;;  %v615_v25 = vunpack.i.h.bf16 %v613_v20  ;;  %v614_v26 = vunpack.i.l.bf16 %v613_v20  ;;  %vm295_vm0 = vmand %vm293_vm2, %vm916_vm7 }
  0xb2   : > { %vm313_vm7 = vcmp.lt.s32.totalorder %v898_v7, 111  ;;  %vm327_vm2 = vcmask 588800  }
  0xb3   : > { %v264_v31 = vsel %vm263_vm5, %v624_v24, %v625_v23  ;;  %v238_v32 = vsel %vm237_vm8, %v614_v26, %v615_v25  ;;  %v239_v34 = vsel %vm237_vm8, %v615_v25, %v614_v26  ;;  %v265_v46 = vsel %vm263_vm5, %v625_v23, %v624_v24  ;;  %vm535_vm5 = vmpackc.low %vm974_vm6, %vm966_vm13 }
  0xb4   : > { %v525_v35 = vpack.c.bf16 %v238_v32, %v223_v29  ;;  %v528_v36 = vpack.c.bf16 %v239_v34, %v224_v33  ;;  %v628_v37 = vpop.permute.xlu0 %627  ;;  %v633_v39 = vpop.permute.xlu1 %632  ;;  %v531_v47 = vpack.c.bf16 %v264_v31, %v249_v28  ;;  %vm289_vm8 = vcmp.lt.s32.totalorder %v898_v7, 113 }
  0xb5   : > { %v630_v40 = vunpack.i.h.bf16 %v628_v37  ;;  %v629_v41 = vunpack.i.l.bf16 %v628_v37  ;;  %v635_v43 = vunpack.i.h.bf16 %v633_v39  ;;  %v634_v44 = vunpack.i.l.bf16 %v633_v39 }
  0xb6   : > { %527 = vmatprep.subr.msk.bf16.mxu0 %vm943_vm14, %v525_v35  ;;  %v534_v52 = vpack.c.bf16 %v265_v46, %v250_v45  ;;  %vm1110_vm14 = vmmov 1   ;;  %vm317_vm6 = vcmp.lt.s32.totalorder %v901_v8, 239 }
  0xb7   : > { %530 = vmatpush1.bf16.msk.msra.mxu0 %vm932_vm12, %v528_v36  ;;  %v278_v48 = vsel %vm276_vm4, %v630_v40, %v629_v41  ;;  %v277_v49 = vsel %vm276_vm4, %v629_v41, %v630_v40  ;;  %vm302_vm12 = vcmp.lt.s32.totalorder %v898_v7, 112  ;;  %v291_v53 = vsel %vm289_vm8, %v635_v43, %v634_v44  ;;  %vm538_vm15 = vmpackc.low %vm282_vm10, %vm1110_vm14 }
  0xb8   : > { %v537_v50 = vpack.c.bf16 %v278_v48, %v889_v1  ;;  %533 = vmatprep.subr.msk.bf16.mxu0 %vm532_vm3, %v531_v47  ;;  %v638_v51 = vpop.permute.xlu0 %637  ;;  %vm306_vm3 = vcmp.lt.s32.totalorder %v901_v8, 240  ;;  %v540_v56 = vpack.c.bf16 %v277_v49, %v887_v0  ;;  %v290_v58 = vsel %vm289_vm8, %v634_v44, %v635_v43  ;;  %vm541_vm13 = vmpackc.low %vm926_vm11, %vm1110_vm14  ;;  %v310_v61 = vpop.permute.xlu1 %309 }
  0xb9   : > { %v640_v54 = vunpack.i.h.bf16 %v638_v51  ;;  %v639_v55 = vunpack.i.l.bf16 %v638_v51  ;;  %vm544_vm4 = vmpackc.low %vm306_vm3, %vm295_vm0 }
  0xba   : > { %vm547_vm8 = vmpackc.low %vm1110_vm14, %vm906_vm1 }
  0xbb   : > { %536 = vmatpush1.bf16.msk.msra.mxu0 %vm535_vm5, %v534_v52  ;;  %v304_v57 = vsel %vm302_vm12, %v640_v54, %v639_v55  ;;  %v303_v59 = vsel %vm302_vm12, %v639_v55, %v640_v54  ;;  %vm319_vm10 = vmand %vm317_vm6, %vm921_vm9 }
  0xbc   : > { %v543_v60 = vpack.c.bf16 %v304_v57, %v291_v53  ;;  %539 = vmatprep.subr.msk.bf16.mxu0 %vm538_vm15, %v537_v50  ;;  %v312_v62 = vpop.permute.xlu0 %311  ;;  %v546_v63 = vpack.c.bf16 %v303_v59, %v290_v58 }
  0xbd   : > { %v315_v0 = vsel %vm313_vm7, %v312_v62, %v310_v61  ;;  %v314_v1 = vsel %vm313_vm7, %v310_v61, %v312_v62 }
  0xbf   : > { %542 = vmatpush1.bf16.msk.msra.mxu0 %vm541_vm13, %v540_v56 }
  0xc0   : > { %545 = vmatprep.subr.msk.bf16.mxu0 %vm544_vm4, %v543_v60 }
  0xc3   : > { %548 = vmatpush1.bf16.msk.msra.mxu0 %vm547_vm8, %v546_v63 }
  0xc4   : > { %515 = vmatprep.subr.msk.mxu0 %vm319_vm10, %v315_v0 }
  0xc7   : > { %516 = vmatpush1.msk.msra.mxu0 %vm926_vm11, %v314_v1 }
  0xc8   : > { %517 = vmatmul.mubr.msk.f32.vlgmr.msra.gmra.mrb[0].mxu0 %vm327_vm2, %v214_v2 }
  0xc9   : > { %v325_v3 = vpop.permute.xlu1 %324 }
 0x19b   : > { %v397_v4 = vpop.f32.mrb[0].mxu0 }
 0x19c   : > { %v398_v5 = vadd.f32 %v397_v4, %v325_v3  ;;  %v399_v6 = vpop.f32.mrb[1].mxu0 }
 0x19d   : > { %v400_v7 = vadd.f32 %v399_v6, %v325_v3 }
 0x19e   : > { %v402_v8 = vmax.f32 %v398_v5, 0.0 }
 0x19f   : > { %v403_v9 = vmax.f32 %v400_v7, 0.0 }
 0x1a1   : > { %v406_v10 = vcombine.low %v402_v8, %v403_v9 }
 0x1a3   : > { %408 = vst [vmem:[%s186_s30] sm:$0xff] %v406_v10 }
 0x1a4   : > { %686 = shalt.err (!%p683_p4)
}
 0x1a5   : > { %s687_s29 = scalar_lea.hbm %s1036_s6, 128  ;;  %s691_s19 = scalar_lea.hbm %s1083_s3, 256 }
 0x1a6   : > { %p688_p5 = scmp.ne.s32.totalorder %s1036_s6, %s687_s29  ;;  %p692_p0 = scmp.lt.u32.totalorder %s1036_s6, %s1083_s3 }
 0x1a7   : > { %p693_p1 = scmp.lt.u32.totalorder %s691_s19, %s687_s29  ;;  %p695_p6 = scmp.lt.u32.totalorder %s687_s29, %s1036_s6 }
 0x1a8   : > { %p689_p8 = pnand %p688_p5, %p1111_p11 }
 0x1a9   : > { %p694_p3 = por %p693_p1, %p692_p0 }
 0x1aa   : > { %p690_p9 = pneg %p689_p8 }
 0x1ab   : > { %p696_p12 = por %p695_p6, %p694_p3 }
 0x1ad   : > { %p697_p13 = pnand %p696_p12, %p690_p9 }
 0x1af   : > { %700 = shalt.err (!%p697_p13)
}
 0x1b0   : > { %551 = dma.vmem_to_hbm [thread:$0]  (%p1111_p11), %s1038_s5, 128, %s1036_s6, %s410_s7  }
 0x1b1 PF: > { %s436_s26 = sand.u32 1, %s727_s12   ;;  %p1112_p7 = scmp.ne.s32.totalorder %s1090_s25, 0 }
 0x1b2   : > { %p1113_p10 = scmp.ge.s32.totalorder %s739_s15, 2  ;;  %s437_s27 = scalar_lea.sflag [#allocation4], %s436_s26 }
 0x1b4   : > { %p558_p2 = pnand %p1113_p10, %p1112_p7 }
 0x1b6   : > { %722 = dma.done.wait (!%p558_p2), %s437_s27, 128  }
 0x1b7   : > { %724 = vsyncadd (!%p558_p2), %s437_s27, 4294967168  ;;  %p16_p4 = scmp.ge.s32.totalorder %s799_s18, 4   ;;  %s1114_s12 = smov %s731_s13 }
 0x1b8   : > { %s1115_s13 = smov %s735_s14  ;;  %s1116_s14 = smov %s811_s21 }
 0x1b9   : > { %s1117_s15 = smov %s799_s18  ;;  %18 = sbr.rel (!%p16_p4) target bundleno = 5 (0x5), region = 77 }
 0x1c0   :  { %442 = vsyncpa [#allocation3], 1 }
 0x1c1   :  { %444 = vsyncpa [#allocation3 + $0x1], 1 }
 0x1c2   :  { %445 = vsyncpa [#allocation4], 1 }
 0x1c3   :  { %447 = vsyncpa [#allocation4 + $0x1], 1 }

</bundles_post_ra>
